<compile_context>
chip_gen: v5e
topology: v5e:2x2
jax: 0.10.0
libtpu: 0.0.40
codegen_flags: <defaults>
</compile_context>

<pallas_src>
import jax
import jax.numpy as jnp
from jax.experimental import pallas as pl
from jax.experimental.pallas import tpu as pltpu

_LANE = 128
_SUBLANE = 8
_MAX_TB = 2048   # batch-tile cap; a few MB of VMEM per step even in f32


def _cdiv(a, b):
    return -(-a // b)


def _round_up(n, m):
    return ((n + m - 1) // m) * m


def _pad2d(a, rows, cols):
    return jnp.pad(a, ((0, rows - a.shape[0]), (0, cols - a.shape[1])))


def _mlp_kernel(x_ref,
                w1_ref, b1_ref,
                w2_ref, b2_ref,
                wc_ref, bc_ref,
                logits_ref, *maybe_feat_ref):
    """Fused MLP forward on one batch tile.

    * BN (eval mode) is pre-folded into (w, b); Dropout is identity.
    * x is read as stored (f32) and cast to the MXU operand dtype on the VPU
      (free — the kernel is mem-bound, VALU has slack).
    * Matmul output dims are 128-padded (lane-dense compute); only the real
      columns are stored to the narrow output refs.
    """
    x = x_ref[...].astype(w1_ref.dtype)

    # hidden layer 1: (Linear + folded BN) -> ReLU
    h1 = jnp.dot(x, w1_ref[...], preferred_element_type=jnp.float32) + b1_ref[...]
    h1 = jnp.maximum(h1, 0.0)

    # hidden layer 2: (Linear + folded BN) -> ReLU
    h2 = jnp.dot(h1.astype(w2_ref.dtype), w2_ref[...],
                 preferred_element_type=jnp.float32) + b2_ref[...]
    h2 = jnp.maximum(h2, 0.0)

    if maybe_feat_ref:  # features output only materialized when requested
        feat_ref = maybe_feat_ref[0]
        feat_ref[...] = h2[:, :feat_ref.shape[-1]]

    # classifier
    logits = jnp.dot(h2.astype(wc_ref.dtype), wc_ref[...],
                     preferred_element_type=jnp.float32) + bc_ref[...]
    logits_ref[...] = logits[:, :logits_ref.shape[-1]]


def prepare_params(params, compute_dtype=jnp.bfloat16):
    """Fold eval-mode BatchNorm1d into the preceding Linear layers, pad all
    matmul output dims to 128 lanes and cast MXU operands to `compute_dtype`.

    Call ONCE per weight set (hoisted off the per-forward latency path)."""
    (w1, b1, g1, be1, rm1, rv1,
     w2, b2, g2, be2, rm2, rv2,
     wc, bc) = params
    eps = 1e-5

    #   (xW + b) * s + t  ==  x (W*s) + (b*s + t)
    s1 = g1 / jnp.sqrt(rv1 + eps)
    t1 = be1 - rm1 * s1
    s2 = g2 / jnp.sqrt(rv2 + eps)
    t2 = be2 - rm2 * s2
    w1f = w1 * s1[None, :]
    b1f = b1 * s1 + t1
    w2f = w2 * s2[None, :]
    b2f = b2 * s2 + t2

    F = w1.shape[0]
    h1d, h2d, out_dim = w1.shape[1], w2.shape[1], wc.shape[1]
    h1p = _round_up(h1d, _LANE)
    h2p = _round_up(h2d, _LANE)
    outp = _round_up(out_dim, _LANE)

    return dict(
        w1=_pad2d(w1f, F, h1p).astype(compute_dtype),
        b1=_pad2d(b1f[None, :], 1, h1p).astype(jnp.float32),
        w2=_pad2d(w2f, h1p, h2p).astype(compute_dtype),
        b2=_pad2d(b2f[None, :], 1, h2p).astype(jnp.float32),
        wc=_pad2d(wc, h2p, outp).astype(compute_dtype),
        bc=_pad2d(bc[None, :], 1, outp).astype(jnp.float32),
        feat_dim=int(h2d),
        out_dim=int(out_dim),
    )


def tabular_model_forward(x, params, return_features=False,
                          compute_dtype=jnp.bfloat16):
    """Fused Pallas forward.  x: [B, input_dim] f32 (as stored).

    `params` is either the dict returned by prepare_params (preferred: prepare
    once, call many times) or the raw 14-tuple of TabularModel weights."""
    if not isinstance(params, dict):
        params = prepare_params(params, compute_dtype=compute_dtype)

    w1p, b1p = params["w1"], params["b1"]
    w2p, b2p = params["w2"], params["b2"]
    wcp, bcp = params["wc"], params["bc"]
    h2d, out_dim = params["feat_dim"], params["out_dim"]

    B, F = x.shape
    h1p = w1p.shape[1]
    h2p = w2p.shape[1]
    outp = wcp.shape[1]

    # Batch tiling: big tiles (per-step DMA >> 0.35 us fixed step overhead),
    # >= 2 grid steps whenever there is enough batch so ("parallel",) can
    # shard the batch across both v7x TensorCores, and tile = cdiv(B, n_steps)
    # rounded to the sublane so padding waste stays < 8 rows per step.
    n_steps = max(1, _cdiv(B, _MAX_TB))
    if B > _SUBLANE:
        n_steps = max(n_steps, 2)
    TB = _round_up(_cdiv(B, n_steps), _SUBLANE)
    Bp = _round_up(B, TB)
    grid = (Bp // TB,)

    # x stays in its stored dtype; pad the batch only when needed.
    xp = x if Bp == B else jnp.pad(x, ((0, Bp - B), (0, 0)))

    in_specs = [
        pl.BlockSpec((TB, F), lambda i: (i, 0)),       # x tile (streamed)
        # Weights/biases: constant index_map -> fetched once, VMEM-resident;
        # Pallas skips the per-step re-DMA when the block index is unchanged.
        pl.BlockSpec((F, h1p), lambda i: (0, 0)),
        pl.BlockSpec((1, h1p), lambda i: (0, 0)),
        pl.BlockSpec((h1p, h2p), lambda i: (0, 0)),
        pl.BlockSpec((1, h2p), lambda i: (0, 0)),
        pl.BlockSpec((h2p, outp), lambda i: (0, 0)),
        pl.BlockSpec((1, outp), lambda i: (0, 0)),
    ]

    # Outputs are written back UNPADDED: out_dim / feat_dim are the full last
    # dims of their arrays, so narrow blocks are legal.  Masked vst per tile is
    # trivial vs. the 64x / 4x writeback DMA it avoids.
    logits_spec = pl.BlockSpec((TB, out_dim), lambda i: (i, 0))
    if return_features:
        out_shape = (jax.ShapeDtypeStruct((Bp, out_dim), jnp.float32),
                     jax.ShapeDtypeStruct((Bp, h2d), jnp.float32))
        out_specs = (logits_spec, pl.BlockSpec((TB, h2d), lambda i: (i, 0)))
    else:
        out_shape = jax.ShapeDtypeStruct((Bp, out_dim), jnp.float32)
        out_specs = logits_spec

    # Advisory cost estimate so XLA schedules around the custom call.
    wt_bytes = sum(int(a.size) * a.dtype.itemsize
                   for a in (w1p, w2p, wcp, b1p, b2p, bcp))
    out_bytes = Bp * out_dim * 4 + (Bp * h2d * 4 if return_features else 0)
    cost = pl.CostEstimate(
        flops=2 * Bp * (F * h1p + h1p * h2p + h2p * outp),
        transcendentals=0,
        bytes_accessed=int(xp.size) * xp.dtype.itemsize + wt_bytes + out_bytes)

    call = pl.pallas_call(
        _mlp_kernel,
        grid=grid,
        in_specs=in_specs,
        out_specs=out_specs,
        out_shape=out_shape,
        compiler_params=pltpu.CompilerParams(
            dimension_semantics=("parallel",)),   # batch sharded across TCs
        cost_estimate=cost,
    )

    if return_features:
        logits_p, feats_p = call(xp, w1p, b1p, w2p, b2p, wcp, bcp)
        if Bp != B:
            logits_p, feats_p = logits_p[:B], feats_p[:B]
        return logits_p, feats_p
    logits_p = call(xp, w1p, b1p, w2p, b2p, wcp, bcp)
    return logits_p[:B] if Bp != B else logits_p


def init_params(key, input_dim, hidden_dims=(64, 32), output_dim=2):
    """Deterministic parameter init (PyTorch-style uniform bounds)."""
    dims = [input_dim] + list(hidden_dims)
    keys = jax.random.split(key, 2 * len(hidden_dims) + 2)
    params = []
    ki = 0
    for i, h in enumerate(hidden_dims):
        fan_in = dims[i]
        bound = 1.0 / jnp.sqrt(fan_in)
        w = jax.random.uniform(keys[ki], (fan_in, h), jnp.float32, -bound, bound); ki += 1
        b = jax.random.uniform(keys[ki], (h,), jnp.float32, -bound, bound); ki += 1
        gamma = jnp.ones((h,), jnp.float32)
        beta = jnp.zeros((h,), jnp.float32)
        running_mean = jnp.zeros((h,), jnp.float32)
        running_var = jnp.ones((h,), jnp.float32)
        params += [w, b, gamma, beta, running_mean, running_var]
    fan_in = hidden_dims[-1]
    bound = 1.0 / jnp.sqrt(fan_in)
    wc = jax.random.uniform(keys[ki], (fan_in, output_dim), jnp.float32, -bound, bound); ki += 1
    bc = jax.random.uniform(keys[ki], (output_dim,), jnp.float32, -bound, bound)
    params += [wc, bc]
    return tuple(params)


def _reference_forward(x, params):
    """Pure-JAX reference for correctness check (eval mode)."""
    (w1, b1, g1, be1, rm1, rv1,
     w2, b2, g2, be2, rm2, rv2,
     wc, bc) = params
    eps = 1e-5
    h = x @ w1 + b1
    h = (h - rm1) / jnp.sqrt(rv1 + eps) * g1 + be1
    h = jnp.maximum(h, 0.0)
    h = h @ w2 + b2
    h = (h - rm2) / jnp.sqrt(rv2 + eps) * g2 + be2
    h = jnp.maximum(h, 0.0)
    return h @ wc + bc, h


if __name__ == "__main__":
    key = jax.random.PRNGKey(0)
    k_x, k_p = jax.random.split(key)

    batch = 8
    input_dim = 23          # "features23" tabular input
    hidden_dims = (64, 32)
    output_dim = 2

    x = jax.random.normal(k_x, (batch, input_dim), dtype=jnp.float32)
    params = init_params(k_p, input_dim, hidden_dims, output_dim)
    ref_logits, ref_feats = _reference_forward(x, params)

    # Default fast path: bf16 MXU operands, f32 accumulation (looser tolerance).
    prepped_bf16 = prepare_params(params, compute_dtype=jnp.bfloat16)
    logits, feats = tabular_model_forward(x, prepped_bf16, return_features=True)
    logits = jax.block_until_ready(logits)
    feats = jax.block_until_ready(feats)
    assert logits.shape == (batch, output_dim)
    assert feats.shape == (batch, hidden_dims[-1])
    assert jnp.allclose(logits, ref_logits, atol=3e-2, rtol=3e-2)
    assert jnp.allclose(feats, ref_feats, atol=3e-2, rtol=3e-2)

    logits_only = jax.block_until_ready(tabular_model_forward(x, prepped_bf16))
    assert jnp.allclose(logits_only, ref_logits, atol=3e-2, rtol=3e-2)

    # f32 reference-precision path + a non-tile-multiple batch (exercises the
    # batch padding and the >=2-step parallel grid).
    prepped_f32 = prepare_params(params, compute_dtype=jnp.float32)
    batch2 = 13
    x2 = jax.random.normal(jax.random.PRNGKey(1), (batch2, input_dim), jnp.float32)
    ref2_logits, ref2_feats = _reference_forward(x2, params)
    l2, f2 = tabular_model_forward(x2, prepped_f32, return_features=True)
    l2 = jax.block_until_ready(l2)
    f2 = jax.block_until_ready(f2)
    assert l2.shape == (batch2, output_dim)
    assert f2.shape == (batch2, hidden_dims[-1])
    assert jnp.allclose(l2, ref2_logits, atol=1e-4, rtol=1e-4)
    assert jnp.allclose(f2, ref2_feats, atol=1e-4, rtol=1e-4)

    print("KERNEL_OK")
</pallas_src>

<mosaic_0001>
module attributes {stable_mosaic.version = 11 : i64} {
  func.func @_mlp_kernel(%arg0: i32, %arg1: memref<8x23xf32, #tpu.memory_space<vmem>>, %arg2: memref<23x128xbf16, #tpu.memory_space<vmem>>, %arg3: memref<1x128xf32, #tpu.memory_space<vmem>>, %arg4: memref<128x128xbf16, #tpu.memory_space<vmem>>, %arg5: memref<1x128xf32, #tpu.memory_space<vmem>>, %arg6: memref<128x128xbf16, #tpu.memory_space<vmem>>, %arg7: memref<1x128xf32, #tpu.memory_space<vmem>>, %arg8: memref<8x2xf32, #tpu.memory_space<vmem>>, %arg9: memref<8x32xf32, #tpu.memory_space<vmem>>) attributes {dimension_semantics = [#tpu.dimension_semantics<parallel>], iteration_bounds = array<i64: 1>, scalar_prefetch = 0 : i64, scratch_operands = 0 : i64, tpu.core_type = #tpu.core_type<tc>, window_params = [{transform_indices = @transform_0, window_bounds = array<i64: 8, 23>}, {pipeline_mode = #tpu.pipeline_mode<synchronous>, transform_indices = @transform_1, window_bounds = array<i64: 23, 128>}, {pipeline_mode = #tpu.pipeline_mode<synchronous>, transform_indices = @transform_2, window_bounds = array<i64: 1, 128>}, {pipeline_mode = #tpu.pipeline_mode<synchronous>, transform_indices = @transform_3, window_bounds = array<i64: 128, 128>}, {pipeline_mode = #tpu.pipeline_mode<synchronous>, transform_indices = @transform_4, window_bounds = array<i64: 1, 128>}, {pipeline_mode = #tpu.pipeline_mode<synchronous>, transform_indices = @transform_5, window_bounds = array<i64: 128, 128>}, {pipeline_mode = #tpu.pipeline_mode<synchronous>, transform_indices = @transform_6, window_bounds = array<i64: 1, 128>}, {transform_indices = @transform_7, window_bounds = array<i64: 8, 2>}, {transform_indices = @transform_8, window_bounds = array<i64: 8, 32>}]} {
    %c0 = arith.constant 0 : index
    %c0_0 = arith.constant 0 : index
    %0 = vector.load %arg1[%c0, %c0_0] : memref<8x23xf32, #tpu.memory_space<vmem>>, vector<8x23xf32>
    %1 = arith.truncf %0 : vector<8x23xf32> to vector<8x23xbf16>
    %c0_1 = arith.constant 0 : index
    %c0_2 = arith.constant 0 : index
    %2 = vector.load %arg2[%c0_1, %c0_2] : memref<23x128xbf16, #tpu.memory_space<vmem>>, vector<23x128xbf16>
    %cst = arith.constant dense<0.000000e+00> : vector<8x128xf32>
    %3 = tpu.matmul %1, %2, %cst {dimension_numbers = #tpu.dot_dimension_numbers<[1], [0], [0], [1], [0, 0, 1, 1], [], []>} : vector<8x23xbf16>, vector<23x128xbf16>, vector<8x128xf32> -> vector<8x128xf32>
    %c0_3 = arith.constant 0 : index
    %c0_4 = arith.constant 0 : index
    %4 = vector.load %arg3[%c0_3, %c0_4] : memref<1x128xf32, #tpu.memory_space<vmem>>, vector<1x128xf32>
    %5 = vector.broadcast %4 : vector<1x128xf32> to vector<8x128xf32>
    %6 = arith.addf %3, %5 : vector<8x128xf32>
    %cst_5 = arith.constant 0.000000e+00 : f32
    %7 = vector.broadcast %cst_5 : f32 to vector<8x128xf32>
    %8 = arith.maximumf %6, %7 : vector<8x128xf32>
    %9 = arith.truncf %8 : vector<8x128xf32> to vector<8x128xbf16>
    %c0_6 = arith.constant 0 : index
    %c0_7 = arith.constant 0 : index
    %10 = vector.load %arg4[%c0_6, %c0_7] : memref<128x128xbf16, #tpu.memory_space<vmem>>, vector<128x128xbf16>
    %cst_8 = arith.constant dense<0.000000e+00> : vector<8x128xf32>
    %11 = tpu.matmul %9, %10, %cst_8 {dimension_numbers = #tpu.dot_dimension_numbers<[1], [0], [0], [1], [0, 0, 1, 1], [], []>} : vector<8x128xbf16>, vector<128x128xbf16>, vector<8x128xf32> -> vector<8x128xf32>
    %c0_9 = arith.constant 0 : index
    %c0_10 = arith.constant 0 : index
    %12 = vector.load %arg5[%c0_9, %c0_10] : memref<1x128xf32, #tpu.memory_space<vmem>>, vector<1x128xf32>
    %13 = vector.broadcast %12 : vector<1x128xf32> to vector<8x128xf32>
    %14 = arith.addf %11, %13 : vector<8x128xf32>
    %cst_11 = arith.constant 0.000000e+00 : f32
    %15 = vector.broadcast %cst_11 : f32 to vector<8x128xf32>
    %16 = arith.maximumf %14, %15 : vector<8x128xf32>
    %17 = vector.extract_strided_slice %16 {offsets = [0, 0], sizes = [8, 32], strides = [1, 1]} : vector<8x128xf32> to vector<8x32xf32>
    %c0_12 = arith.constant 0 : index
    %c0_13 = arith.constant 0 : index
    %18 = vector.load %arg9[%c0_12, %c0_13] : memref<8x32xf32, #tpu.memory_space<vmem>>, vector<8x32xf32>
    tpu.vector_store %arg9[%c0_12, %c0_13], %17 {strides = array<i32>} : memref<8x32xf32, #tpu.memory_space<vmem>>, vector<8x32xf32>,
    %19 = arith.truncf %16 : vector<8x128xf32> to vector<8x128xbf16>
    %c0_14 = arith.constant 0 : index
    %c0_15 = arith.constant 0 : index
    %20 = vector.load %arg6[%c0_14, %c0_15] : memref<128x128xbf16, #tpu.memory_space<vmem>>, vector<128x128xbf16>
    %cst_16 = arith.constant dense<0.000000e+00> : vector<8x128xf32>
    %21 = tpu.matmul %19, %20, %cst_16 {dimension_numbers = #tpu.dot_dimension_numbers<[1], [0], [0], [1], [0, 0, 1, 1], [], []>} : vector<8x128xbf16>, vector<128x128xbf16>, vector<8x128xf32> -> vector<8x128xf32>
    %c0_17 = arith.constant 0 : index
    %c0_18 = arith.constant 0 : index
    %22 = vector.load %arg7[%c0_17, %c0_18] : memref<1x128xf32, #tpu.memory_space<vmem>>, vector<1x128xf32>
    %23 = vector.broadcast %22 : vector<1x128xf32> to vector<8x128xf32>
    %24 = arith.addf %21, %23 : vector<8x128xf32>
    %25 = vector.extract_strided_slice %24 {offsets = [0, 0], sizes = [8, 2], strides = [1, 1]} : vector<8x128xf32> to vector<8x2xf32>
    %c0_19 = arith.constant 0 : index
    %c0_20 = arith.constant 0 : index
    %26 = vector.load %arg8[%c0_19, %c0_20] : memref<8x2xf32, #tpu.memory_space<vmem>>, vector<8x2xf32>
    tpu.vector_store %arg8[%c0_19, %c0_20], %25 {strides = array<i32>} : memref<8x2xf32, #tpu.memory_space<vmem>>, vector<8x2xf32>,
    return
  }
  func.func @transform_0(%arg0: i32) -> (i32, i32) {
    %c0_i32 = arith.constant 0 : i32
    %c0_i32_0 = arith.constant 0 : i32
    return %arg0, %c0_i32 : i32, i32
  }
  func.func @transform_1(%arg0: i32) -> (i32, i32) {
    %c0_i32 = arith.constant 0 : i32
    %c0_i32_0 = arith.constant 0 : i32
    %c0_i32_1 = arith.constant 0 : i32
    return %c0_i32, %c0_i32_0 : i32, i32
  }
  func.func @transform_2(%arg0: i32) -> (i32, i32) {
    %c0_i32 = arith.constant 0 : i32
    %c0_i32_0 = arith.constant 0 : i32
    %c0_i32_1 = arith.constant 0 : i32
    return %c0_i32, %c0_i32_0 : i32, i32
  }
  func.func @transform_3(%arg0: i32) -> (i32, i32) {
    %c0_i32 = arith.constant 0 : i32
    %c0_i32_0 = arith.constant 0 : i32
    %c0_i32_1 = arith.constant 0 : i32
    return %c0_i32, %c0_i32_0 : i32, i32
  }
  func.func @transform_4(%arg0: i32) -> (i32, i32) {
    %c0_i32 = arith.constant 0 : i32
    %c0_i32_0 = arith.constant 0 : i32
    %c0_i32_1 = arith.constant 0 : i32
    return %c0_i32, %c0_i32_0 : i32, i32
  }
  func.func @transform_5(%arg0: i32) -> (i32, i32) {
    %c0_i32 = arith.constant 0 : i32
    %c0_i32_0 = arith.constant 0 : i32
    %c0_i32_1 = arith.constant 0 : i32
    return %c0_i32, %c0_i32_0 : i32, i32
  }
  func.func @transform_6(%arg0: i32) -> (i32, i32) {
    %c0_i32 = arith.constant 0 : i32
    %c0_i32_0 = arith.constant 0 : i32
    %c0_i32_1 = arith.constant 0 : i32
    return %c0_i32, %c0_i32_0 : i32, i32
  }
  func.func @transform_7(%arg0: i32) -> (i32, i32) {
    %c0_i32 = arith.constant 0 : i32
    %c0_i32_0 = arith.constant 0 : i32
    return %arg0, %c0_i32 : i32, i32
  }
  func.func @transform_8(%arg0: i32) -> (i32, i32) {
    %c0_i32 = arith.constant 0 : i32
    %c0_i32_0 = arith.constant 0 : i32
    return %arg0, %c0_i32 : i32, i32
  }
}

</mosaic_0001>

<bundles_post_ra>
// kernel: tpu_custom_call.1
= control target key start
LH: loop header
LB: loop body
LE: loop exit
PB: predicated region body
PF: predicated region fallthrough
CT: control target
= control target key end

     0   :  { %14 = vsyncpa [#allocation3], 0  ;;  %s631_s0 = inlined_call_operand.hbm [shape: f32[8,23], index: 0, kind: input, shape index: {}]   ;;  %s632_s1 = inlined_call_operand.hbm [shape: bf16[23,128], index: 1, kind: input, shape index: {}]   ;;  %s633_s2 = inlined_call_operand.vmem [shape: f32[1,128], index: 2, kind: input, shape index: {}]   ;;  %s634_s3 = inlined_call_operand.hbm [shape: bf16[128,128], index: 3, kind: input, shape index: {}]   ;;  %s635_s4 = inlined_call_operand.vmem [shape: f32[1,128], index: 4, kind: input, shape index: {}]   ;;  %s636_s5 = inlined_call_operand.hbm [shape: bf16[128,128], index: 5, kind: input, shape index: {}]   ;;  %s637_s6 = inlined_call_operand.vmem [shape: f32[1,128], index: 6, kind: input, shape index: {}]   ;;  %s638_s7 = inlined_call_operand.vmem [shape: f32[8,2], index: 7, kind: output, shape index: {0}]   ;;  %s639_s8 = inlined_call_operand.hbm [shape: f32[8,32], index: 8, kind: output, shape index: {1}]  }
   0x1   :  { %15 = vsyncpa [#allocation6], 0 }
   0x2   :  { %16 = vsyncpa [#allocation9], 0  ;;  %s33_s29 = sshll.u32 %s632_s1, 4  ;;  %s34_s29 = int_to_ptr.hbm [resolvable:$true] %s33_s29 }
   0x3   :  { %17 = vsyncpa [#allocation4], 0  ;;  %s551_s30 = smov [#allocation5]   ;;  %s23_s12 = sshll.u32 %s631_s0, 4  ;;  %s24_s12 = int_to_ptr.hbm [resolvable:$true] %s23_s12 }
   0x4   :  { %s35_s9 = sshll.u32 %s551_s30, 4  ;;  %s552_s13 = smov 64   ;;  %s36_s9 = int_to_ptr.vmem [resolvable:$true] %s35_s9 }
   0x5   :  { %s553_s14 = smov 4   ;;  %s554_s15 = smov [#allocation2]  }
   0x6   :  { %41 = dma.hbm_to_vmem [thread:$0]  %s34_s29, 192, %s36_s9, [#allocation6], %s552_s13, %s552_s13, %s553_s14  }
   0x7   :  { %s25_s16 = sshll.u32 %s554_s15, 4  ;;  %s48_s19 = sshll.u32 %s634_s3, 4  ;;  %s26_s16 = int_to_ptr.vmem [resolvable:$true] %s25_s16  ;;  %s49_s19 = int_to_ptr.hbm [resolvable:$true] %s48_s19 }
   0x8   :  { %28 = dma.hbm_to_vmem [thread:$0]  %s24_s12, 128, %s26_s16, [#allocation3]  }
   0x9   :  { %s63_s21 = sshll.u32 %s636_s5, 4  ;;  %s555_s22 = smov [#allocation7]   ;;  %s64_s21 = int_to_ptr.hbm [resolvable:$true] %s63_s21 }
   0xa   :  { %s50_s23 = sshll.u32 %s555_s22, 4  ;;  %s556_s0 = smov [#allocation8]   ;;  %s51_s23 = int_to_ptr.vmem [resolvable:$true] %s50_s23 }
   0xb   :  { %56 = dma.hbm_to_vmem [thread:$0]  %s49_s19, 1024, %s51_s23, [#allocation6], %s552_s13, %s552_s13, %s553_s14  }
   0xc   :  { %s65_s24 = sshll.u32 %s556_s0, 4  ;;  %s66_s24 = int_to_ptr.vmem [resolvable:$true] %s65_s24 }
   0xd   :  { %71 = dma.hbm_to_vmem [thread:$0]  %s64_s21, 1024, %s66_s24, [#allocation9], %s552_s13, %s552_s13, %s553_s14  }
   0xe   :  { %543 = dma.done.wait [#allocation3], 128  }
   0xf   :  { %544 = vsyncadd [#allocation3], 4294967168 }
  0x10   :  { %545 = dma.done.wait [#allocation6], 1216  }
  0x11   :  { %546 = vsyncadd [#allocation6], 4294966080 }
  0x12   :  { %547 = dma.done.wait [#allocation9], 1024  }
  0x13   :  { %548 = vsyncadd [#allocation9], 4294966272  ;;  %vm113_vm0 = vcmask 1042432   ;;  %vm114_vm1 = vcmask 1043456   ;;  %v557_v0 = vmov 65535   ;;  %v403_v4 = vld [vmem:[#allocation7 + $0x38] sm:$0xff] }
  0x14   :  { %v115_v1 = vsel %vm113_vm0, 4294967295, %v557_v0  ;;  %v95_v2 = vld [vmem:[#allocation5 + $0x8] sm:$0xf]  ;;  %203 = vmatpush.bf16.msra.mxu1 %v403_v4  ;;  %v402_v7 = vld [vmem:[#allocation7 + $0x30] sm:$0xff]  ;;  %v401_v11 = vld [vmem:[#allocation7 + $0x28] sm:$0xff]  ;;  %vm109_vm2 = vcmask 187392  }
  0x15   :  { %v105_v3 = vunpack.c.l.b16 %v95_v2  ;;  %v116_v5 = vsel %vm114_vm1, %v115_v1, 0  ;;  %v395_v9 = vld [vmem:[#allocation5] sm:$0xff]  ;;  %v91_v10 = vld [vmem:[#allocation2] sm:$0xff]  ;;  %v400_v13 = vld [vmem:[#allocation7 + $0x20] sm:$0xff]  ;;  %vm217_vm3 = vcmask 261120   ;;  %s312_s30 = sshll.u32 %s639_s8, 4  ;;  %s313_s30 = int_to_ptr.hbm [resolvable:$true] %s312_s30 }
  0x16   :  { %v92_v12 = vpack.c.bf16 %v91_v10, %v91_v10  ;;  %v399_v14 = vld [vmem:[#allocation7 + $0x18] sm:$0xff]  ;;  %v398_v15 = vld [vmem:[#allocation7 + $0x10] sm:$0xff]  ;;  %v397_v16 = vld [vmem:[#allocation7 + $0x8] sm:$0xff]  ;;  %vm301_vm4 = vcmask 15360  }
  0x17   :  { %v107_v6 = vpack.c.b16 %v105_v3, %v105_v3  ;;  %v396_v17 = vld [vmem:[#allocation7] sm:$0xff]  ;;  %v411_v18 = vld [vmem:[#allocation8 + $0x38] sm:$0xff]  ;;  %v410_v19 = vld [vmem:[#allocation8 + $0x30] sm:$0xff] }
  0x18   :  { %204 = vmatpush.bf16.msra.mxu1 %v402_v7  ;;  %288 = vmatpush.bf16.msra.mxu2 %v411_v18  ;;  %v409_v20 = vld [vmem:[#allocation8 + $0x28] sm:$0xff]  ;;  %v408_v21 = vld [vmem:[#allocation8 + $0x20] sm:$0xff]  ;;  %v407_v22 = vld [vmem:[#allocation8 + $0x18] sm:$0xff] }
  0x19   :  { %v118_v8 = vand.u32 %v116_v5, %v107_v6  ;;  %v406_v23 = vld [vmem:[#allocation8 + $0x10] sm:$0xff]  ;;  %v420_v24 = vld [vmem:[%s633_s2] ss:$0 sm:$0xff]  ;;  %v404_v31 = vld [vmem:[#allocation8] sm:$0xff]  ;;  %s558_s2 = smov [#allocation10]  }
  0x1a   :  { %v405_v30 = vld [vmem:[#allocation8 + $0x8] sm:$0xff]  ;;  %s310_s27 = sshll.u32 %s558_s2, 4  ;;  %s311_s27 = int_to_ptr.vmem [resolvable:$true] %s310_s27 }
  0x1b   :  { %126 = vmatpush.bf16.msra.mxu0 %v118_v8  ;;  %v421_v32 = vld [vmem:[%s635_s4] ss:$0 sm:$0xff] }
  0x1c   :  { %205 = vmatpush.bf16.msra.mxu1 %v401_v11  ;;  %289 = vmatpush.bf16.msra.mxu2 %v410_v19  ;;  %v422_v38 = vld [vmem:[%s637_s6] ss:$0 sm:$0xff] }
  0x1f   :  { %127 = vmatpush.bf16.msra.mxu0 %v395_v9 }
  0x20   :  { %206 = vmatpush.bf16.msra.mxu1 %v400_v13  ;;  %290 = vmatpush.bf16.msra.mxu2 %v409_v20 }
  0x22   :  { %330 = vmatmul.msk.bf16.vlgmr.msra.gmra.mxu0 %vm109_vm2, %v92_v12 }
  0x24   :  { %207 = vmatpush.bf16.msra.mxu1 %v399_v14  ;;  %291 = vmatpush.bf16.msra.mxu2 %v408_v21 }
  0x28   :  { %208 = vmatpush.bf16.msra.mxu1 %v398_v15  ;;  %292 = vmatpush.bf16.msra.mxu2 %v407_v22 }
  0x2c   :  { %209 = vmatpush.bf16.msra.mxu1 %v397_v16  ;;  %293 = vmatpush.bf16.msra.mxu2 %v406_v23 }
  0x30   :  { %210 = vmatpush.bf16.msra.mxu1 %v396_v17  ;;  %294 = vmatpush.bf16.msra.mxu2 %v405_v30 }
  0x34   :  { %295 = vmatpush.bf16.msra.mxu2 %v404_v31 }
  0x9f   :  { %v129_v25 = vpop.f32.mrf.mxu0 }
  0xa0   :  { %v130_v26 = vadd.f32 %v420_v24, %v129_v25 }
  0xa2   :  { %v133_v27 = vmax.f32 %v130_v26, 0.0 }
  0xa4   :  { %v134_v28 = vpack.c.bf16 %v133_v27, %v133_v27 }
  0xa6   :  { %211 = vmatmul.bf16.vlgmr.msra.gmra.mxu1 %v134_v28 }
  0xa7   :  { %v131_v29 = vpop.f32.mrf.mxu0 }
 0x123   :  { %v212_v33 = vpop.f32.mrf.mxu1 }
 0x124   :  { %v213_v34 = vadd.f32 %v421_v32, %v212_v33 }
 0x126   :  { %v216_v35 = vmax.f32 %v213_v34, 0.0 }
 0x128   :  { %v219_v36 = vpack.c.bf16 %v216_v35, %v216_v35  ;;  %218 = vst.msk [vmem:[#allocation10] sm:$0xff] %vm217_vm3, %v216_v35 }
 0x129   :  { %315 = dma.vmem_to_hbm [thread:$0]  %s311_s27, 128, %s313_s30, [#allocation4]  }
 0x12a   :  { %296 = vmatmul.bf16.vlgmr.msra.gmra.mxu2 %v219_v36 }
 0x12b   :  { %v214_v37 = vpop.f32.mrf.mxu1 }
 0x1ad   :  { %v297_v39 = vpop.f32.mrf.mxu2 }
 0x1ae   :  { %v298_v40 = vadd.f32 %v422_v38, %v297_v39 }
 0x1b0   :  { %302 = vst.msk [vmem:[%s638_s7] sm:$0xff] %vm301_vm4, %v298_v40 }
 0x1b5   :  { %v299_v41 = vpop.f32.mrf.mxu2 }
 0x1b6   :  { %549 = dma.done.wait [#allocation4], 128  }
 0x1b7   :  { %550 = vsyncadd [#allocation4], 4294967168 }
 0x1b8   :  { %322 = vsyncpa [#allocation3], 1 }
 0x1b9   :  { %323 = vsyncpa [#allocation6], 1 }
 0x1ba   :  { %324 = vsyncpa [#allocation9], 1 }
 0x1bb   :  { %325 = vsyncpa [#allocation4], 1 }

</bundles_post_ra>
